<compile_context>
chip_gen: v6e
topology: v6e:2x2x1
jax: 0.10.0
libtpu: 0.0.40
codegen_flags: <defaults>
</compile_context>

<pallas_src>
import functools

import jax
import jax.numpy as jnp
from jax.experimental import pallas as pl
from jax.experimental.pallas import tpu as pltpu

_IGNORE_INDEX = -100  # torch.nn.CrossEntropyLoss default


def _ce_kernel(logits_ref, labels_ref, out_ref, lsum_ref, cnt_ref, *,
               n_true, ignore_index):
    """One batch tile of cross entropy on the natural (N, C) layout.

    logits_ref: (TILE_N, C) input dtype (bf16/f16/f32), batch on sublanes
    labels_ref: (TILE_N, 1) int32
    out_ref   : (1, 1) float32 SMEM (final mean loss)
    lsum_ref  : (TILE_N, 1) float32 VMEM accumulator (per-row partial loss)
    cnt_ref   : (TILE_N, 1) float32 VMEM accumulator (per-row valid count)
    """
    i = pl.program_id(0)

    @pl.when(i == 0)
    def _init():
        lsum_ref[...] = jnp.zeros_like(lsum_ref)
        cnt_ref[...] = jnp.zeros_like(cnt_ref)

    x = logits_ref[...].astype(jnp.float32)           # (TN, C)
    lab = labels_ref[...]                             # (TN, 1) int32
    tn, c = x.shape

    # Mask rows past the true batch end (last tile may overrun N; those rows
    # hold garbage) and rows carrying torch's ignore_index.
    row = jax.lax.broadcasted_iota(jnp.int32, (tn, 1), 0) + i * tn
    valid = (row < n_true) & (lab != ignore_index)    # (TN, 1) bool

    # Numerically stable per-row loss:
    #   loss = log(sum_c exp(x - m)) - (x_target - m)
    m = jnp.max(x, axis=1, keepdims=True)                              # (TN, 1)
    xm = x - m
    denom = jnp.sum(jnp.exp(xm), axis=1, keepdims=True)                # (TN, 1)
    onehot = jax.lax.broadcasted_iota(jnp.int32, (tn, c), 1) == lab    # (TN, C)
    tgt = jnp.sum(jnp.where(onehot, xm, 0.0), axis=1, keepdims=True)   # (TN, 1)

    # Select (never multiply-by-mask) so garbage/NaN in masked rows can't leak.
    loss = jnp.where(valid, jnp.log(denom) - tgt, 0.0)                 # (TN, 1)

    # Vector accumulation; the single reduction happens once at finalize.
    lsum_ref[...] += loss
    cnt_ref[...] += valid.astype(jnp.float32)

    @pl.when(i == pl.num_programs(0) - 1)
    def _finalize():
        # 0/0 -> NaN if every label is ignore_index (matches torch).
        out_ref[0, 0] = jnp.sum(lsum_ref[...]) / jnp.sum(cnt_ref[...])


def _pick_tile_rows(itemsize):
    """Max batch rows per tile from the *padded* VMEM footprint.

    Per row of the batch (minor dim padded to 128 lanes in VMEM):
      logits block : 128 * itemsize bytes, double-buffered
      labels block : 128 * 4 bytes (int32), double-buffered
      accumulators : 2 * 128 * 4 bytes (single-buffered scratch)
    Budget ~24 MiB, under the 32 MiB vmem_limit we request (safe on
    v5e/v6e 128 MiB physical and v7x 64 MiB physical / 32 MiB default).
    """
    per_row = 2 * 128 * itemsize + 2 * 128 * 4 + 2 * 128 * 4
    budget = 24 * 1024 * 1024
    rows = (budget // per_row // 512) * 512
    return int(max(512, min(rows, 16384)))


@functools.partial(jax.jit, static_argnames=("tile_n",))
def cross_entropy_pallas(logits, labels, *, tile_n=None):
    """CrossEntropyLoss (mean over non-ignored) for logits (N, C), labels (N,)."""
    n, c = logits.shape
    # Metadata-only reshape; logits are passed untouched (no transpose, no pad).
    labels2d = labels.astype(jnp.int32).reshape(n, 1)

    if tile_n is None:
        tile_n = _pick_tile_rows(jnp.dtype(logits.dtype).itemsize)

    if n <= tile_n:
        tn = n                               # single full block (num_tiles = 1)
    else:
        tn = max(8, (int(tile_n) // 8) * 8)  # sublane-aligned tile rows
    num_tiles = pl.cdiv(n, tn)               # last tile may overrun N (masked)

    kernel = functools.partial(_ce_kernel, n_true=n, ignore_index=_IGNORE_INDEX)
    out = pl.pallas_call(
        kernel,
        out_shape=jax.ShapeDtypeStruct((1, 1), jnp.float32),
        grid=(num_tiles,),
        in_specs=[
            pl.BlockSpec((tn, c), lambda i: (i, 0)),   # logits tile (TILE_N, C)
            pl.BlockSpec((tn, 1), lambda i: (i, 0)),   # labels tile (TILE_N, 1)
        ],
        out_specs=pl.BlockSpec(memory_space=pltpu.SMEM),   # scalar, resident
        scratch_shapes=[pltpu.VMEM((tn, 1), jnp.float32),  # per-row loss sum
                        pltpu.VMEM((tn, 1), jnp.float32)], # per-row valid cnt
        compiler_params=pltpu.CompilerParams(
            dimension_semantics=("arbitrary",),            # reduction over tiles
            vmem_limit_bytes=32 * 1024 * 1024),
    )(logits, labels2d)
    return out[0, 0]


class MTLRetinalSumLoss:
    """JAX/Pallas port of the PyTorch MTLRetinalSumLoss module."""

    def __init__(self):
        self._selector = 0

    def __call__(self, preds, cac, dr):
        # Selector logic is a Python-level None check (same as the torch code).
        self._selector = 0 if preds[1] is None else 1
        if self._selector == 0:
            assert preds[0] is not None
            return cross_entropy_pallas(preds[0], cac)
        assert preds[1] is not None
        return cross_entropy_pallas(preds[1], dr)


def _reference_ce(logits, labels, ignore_index=_IGNORE_INDEX):
    logits = logits.astype(jnp.float32)
    logp = jax.nn.log_softmax(logits, axis=-1)
    labels = labels.astype(jnp.int32)
    valid = labels != ignore_index
    safe = jnp.where(valid, labels, 0)
    nll = -jnp.take_along_axis(logp, safe[:, None], axis=-1)[:, 0]
    return jnp.sum(jnp.where(valid, nll, 0.0)) / jnp.sum(valid)


if __name__ == "__main__":
    key = jax.random.PRNGKey(0)
    k0, k1, k2, k3, k4, k5 = jax.random.split(key, 6)

    # Small shapes implied by the module: two classification heads.
    N, C_CAC, C_DR = 8, 5, 4
    cac_logits = jax.random.normal(k0, (N, C_CAC), dtype=jnp.float32)
    dr_logits = jax.random.normal(k1, (N, C_DR), dtype=jnp.float32)
    cac_labels = jax.random.randint(k2, (N,), 0, C_CAC, dtype=jnp.int32)
    dr_labels = jax.random.randint(k3, (N,), 0, C_DR, dtype=jnp.int32)

    loss_mod = MTLRetinalSumLoss()

    # Path 0: preds[1] is None -> cross entropy on (preds[0], cac)
    loss_cac = jax.block_until_ready(
        loss_mod((cac_logits, None), cac_labels, dr_labels))
    # Path 1: preds[1] is not None -> cross entropy on (preds[1], dr)
    loss_dr = jax.block_until_ready(
        loss_mod((cac_logits, dr_logits), cac_labels, dr_labels))

    assert jnp.allclose(loss_cac, _reference_ce(cac_logits, cac_labels),
                        atol=1e-5, rtol=1e-5)
    assert jnp.allclose(loss_dr, _reference_ce(dr_logits, dr_labels),
                        atol=1e-5, rtol=1e-5)

    # Multi-tile + last-tile overrun (300 % 128 != 0) + bf16 (no wrapper
    # upcast) + ignore_index path.
    N2 = 300
    big_logits = jax.random.normal(k4, (N2, C_CAC),
                                   dtype=jnp.float32).astype(jnp.bfloat16)
    big_labels = jax.random.randint(k5, (N2,), 0, C_CAC, dtype=jnp.int32)
    big_labels = big_labels.at[::37].set(_IGNORE_INDEX)
    loss_big = jax.block_until_ready(
        cross_entropy_pallas(big_logits, big_labels, tile_n=128))
    assert jnp.allclose(loss_big, _reference_ce(big_logits, big_labels),
                        atol=1e-4, rtol=1e-4)

    print("KERNEL_OK")
</pallas_src>

<mosaic_0001>
module attributes {stable_mosaic.version = 11 : i64} {
  func.func @_ce_kernel(%arg0: i32, %arg1: memref<8x5xf32, #tpu.memory_space<vmem>>, %arg2: memref<8x1xi32, #tpu.memory_space<vmem>>, %arg3: memref<1x1xf32, #tpu.memory_space<smem>>, %arg4: memref<8x1xf32, #tpu.memory_space<vmem>>, %arg5: memref<8x1xf32, #tpu.memory_space<vmem>>) attributes {dimension_semantics = [#tpu.dimension_semantics<arbitrary>], iteration_bounds = array<i64: 1>, scalar_prefetch = 0 : i64, scratch_operands = 2 : i64, tpu.core_type = #tpu.core_type<tc>, window_params = [{transform_indices = @transform_0, window_bounds = array<i64: 8, 5>}, {transform_indices = @transform_1, window_bounds = array<i64: 8, 1>}, {transform_indices = @transform_2, window_bounds = array<i64: 1, 1>}]} {
    %c0_i32 = arith.constant 0 : i32
    %0 = arith.cmpi eq, %arg0, %c0_i32 : i32
    %1 = arith.extui %0 : i1 to i32
    %c0_i32_0 = arith.constant 0 : i32
    %2 = arith.cmpi ne, %1, %c0_i32_0 : i32
    scf.if %2 {
      %cst_19 = arith.constant 0.000000e+00 : f32
      %43 = vector.broadcast %cst_19 : f32 to vector<8x1xf32>
      %c0_20 = arith.constant 0 : index
      %c0_21 = arith.constant 0 : index
      %44 = vector.load %arg4[%c0_20, %c0_21] : memref<8x1xf32, #tpu.memory_space<vmem>>, vector<8x1xf32>
      tpu.vector_store %arg4[%c0_20, %c0_21], %43 {strides = array<i32>} : memref<8x1xf32, #tpu.memory_space<vmem>>, vector<8x1xf32>,
      %cst_22 = arith.constant 0.000000e+00 : f32
      %45 = vector.broadcast %cst_22 : f32 to vector<8x1xf32>
      %c0_23 = arith.constant 0 : index
      %c0_24 = arith.constant 0 : index
      %46 = vector.load %arg5[%c0_23, %c0_24] : memref<8x1xf32, #tpu.memory_space<vmem>>, vector<8x1xf32>
      tpu.vector_store %arg5[%c0_23, %c0_24], %45 {strides = array<i32>} : memref<8x1xf32, #tpu.memory_space<vmem>>, vector<8x1xf32>,
    } else {
    }
    %c0 = arith.constant 0 : index
    %c0_1 = arith.constant 0 : index
    %3 = vector.load %arg1[%c0, %c0_1] : memref<8x5xf32, #tpu.memory_space<vmem>>, vector<8x5xf32>
    %c0_2 = arith.constant 0 : index
    %c0_3 = arith.constant 0 : index
    %4 = vector.load %arg2[%c0_2, %c0_3] : memref<8x1xi32, #tpu.memory_space<vmem>>, vector<8x1xi32>
    %5 = tpu.iota {dimensions = array<i32: 0>} : vector<8x1xi32>
    %c8_i32 = arith.constant 8 : i32
    %6 = arith.muli %arg0, %c8_i32 : i32
    %7 = vector.broadcast %6 : i32 to vector<8x1xi32>
    %8 = arith.addi %5, %7 : vector<8x1xi32>
    %c8_i32_4 = arith.constant 8 : i32
    %9 = vector.broadcast %c8_i32_4 : i32 to vector<8x1xi32>
    %10 = arith.cmpi slt, %8, %9 : vector<8x1xi32>
    %c-100_i32 = arith.constant -100 : i32
    %11 = vector.broadcast %c-100_i32 : i32 to vector<8x1xi32>
    %12 = arith.cmpi ne, %4, %11 : vector<8x1xi32>
    %13 = arith.andi %10, %12 : vector<8x1xi1>
    %cst = arith.constant dense<0xFF800000> : vector<8xf32>
    %14 = vector.multi_reduction <maximumf>, %3, %cst [1] : vector<8x5xf32> to vector<8xf32>
    %15 = vector.shape_cast %14 : vector<8xf32> to vector<8x1xf32>
    %16 = vector.broadcast %15 : vector<8x1xf32> to vector<8x5xf32>
    %17 = arith.subf %3, %16 : vector<8x5xf32>
    %18 = math.exp %17 : vector<8x5xf32>
    %cst_5 = arith.constant dense<0.000000e+00> : vector<8xf32>
    %19 = vector.multi_reduction <add>, %18, %cst_5 [1] : vector<8x5xf32> to vector<8xf32>
    %20 = vector.shape_cast %19 : vector<8xf32> to vector<8x1xf32>
    %21 = tpu.iota {dimensions = array<i32: 1>} : vector<8x5xi32>
    %22 = vector.broadcast %4 : vector<8x1xi32> to vector<8x5xi32>
    %23 = arith.cmpi eq, %21, %22 : vector<8x5xi32>
    %cst_6 = arith.constant 0.000000e+00 : f32
    %24 = vector.broadcast %cst_6 : f32 to vector<8x5xf32>
    %25 = arith.select %23, %17, %24 : vector<8x5xi1>, vector<8x5xf32>
    %cst_7 = arith.constant dense<0.000000e+00> : vector<8xf32>
    %26 = vector.multi_reduction <add>, %25, %cst_7 [1] : vector<8x5xf32> to vector<8xf32>
    %27 = vector.shape_cast %26 : vector<8xf32> to vector<8x1xf32>
    %28 = math.log %20 : vector<8x1xf32>
    %29 = arith.subf %28, %27 : vector<8x1xf32>
    %cst_8 = arith.constant 0.000000e+00 : f32
    %30 = vector.broadcast %cst_8 : f32 to vector<8x1xf32>
    %31 = arith.select %13, %29, %30 : vector<8x1xi1>, vector<8x1xf32>
    %c0_9 = arith.constant 0 : index
    %c0_10 = arith.constant 0 : index
    %32 = vector.load %arg4[%c0_9, %c0_10] : memref<8x1xf32, #tpu.memory_space<vmem>>, vector<8x1xf32>
    %33 = arith.addf %32, %31 : vector<8x1xf32>
    %c0_11 = arith.constant 0 : index
    %c0_12 = arith.constant 0 : index
    %34 = vector.load %arg4[%c0_11, %c0_12] : memref<8x1xf32, #tpu.memory_space<vmem>>, vector<8x1xf32>
    tpu.vector_store %arg4[%c0_11, %c0_12], %33 {strides = array<i32>} : memref<8x1xf32, #tpu.memory_space<vmem>>, vector<8x1xf32>,
    %c0_13 = arith.constant 0 : index
    %c0_14 = arith.constant 0 : index
    %35 = vector.load %arg5[%c0_13, %c0_14] : memref<8x1xf32, #tpu.memory_space<vmem>>, vector<8x1xf32>
    %36 = arith.extui %13 : vector<8x1xi1> to vector<8x1xi32>
    %37 = arith.sitofp %36 : vector<8x1xi32> to vector<8x1xf32>
    %38 = arith.addf %35, %37 : vector<8x1xf32>
    %c0_15 = arith.constant 0 : index
    %c0_16 = arith.constant 0 : index
    %39 = vector.load %arg5[%c0_15, %c0_16] : memref<8x1xf32, #tpu.memory_space<vmem>>, vector<8x1xf32>
    tpu.vector_store %arg5[%c0_15, %c0_16], %38 {strides = array<i32>} : memref<8x1xf32, #tpu.memory_space<vmem>>, vector<8x1xf32>,
    %c0_i32_17 = arith.constant 0 : i32
    %40 = arith.cmpi eq, %arg0, %c0_i32_17 : i32
    %41 = arith.extui %40 : i1 to i32
    %c0_i32_18 = arith.constant 0 : i32
    %42 = arith.cmpi ne, %41, %c0_i32_18 : i32
    scf.if %42 {
      %c0_19 = arith.constant 0 : index
      %c0_20 = arith.constant 0 : index
      %43 = vector.load %arg4[%c0_19, %c0_20] : memref<8x1xf32, #tpu.memory_space<vmem>>, vector<8x1xf32>
      %44 = vector.shape_cast %43 : vector<8x1xf32> to vector<1x8x1xf32>
      %cst_21 = arith.constant dense<0.000000e+00> : vector<1xf32>
      %45 = vector.multi_reduction <add>, %44, %cst_21 [1, 2] : vector<1x8x1xf32> to vector<1xf32>
      %46 = vector.shape_cast %45 : vector<1xf32> to vector<1x1x1xf32>
      %47 = vector.extract %46[0, 0, 0] : f32 from vector<1x1x1xf32>
      %c0_22 = arith.constant 0 : index
      %c0_23 = arith.constant 0 : index
      %48 = vector.load %arg5[%c0_22, %c0_23] : memref<8x1xf32, #tpu.memory_space<vmem>>, vector<8x1xf32>
      %49 = vector.shape_cast %48 : vector<8x1xf32> to vector<1x8x1xf32>
      %cst_24 = arith.constant dense<0.000000e+00> : vector<1xf32>
      %50 = vector.multi_reduction <add>, %49, %cst_24 [1, 2] : vector<1x8x1xf32> to vector<1xf32>
      %51 = vector.shape_cast %50 : vector<1xf32> to vector<1x1x1xf32>
      %52 = vector.extract %51[0, 0, 0] : f32 from vector<1x1x1xf32>
      %53 = arith.divf %47, %52 : f32
      %c0_25 = arith.constant 0 : index
      %c0_26 = arith.constant 0 : index
      %54 = memref.load %arg3[%c0_25, %c0_26] : memref<1x1xf32, #tpu.memory_space<smem>>
      memref.store %53, %arg3[%c0_25, %c0_26] : memref<1x1xf32, #tpu.memory_space<smem>>
    } else {
    }
    return
  }
  func.func @transform_0(%arg0: i32) -> (i32, i32) {
    %c0_i32 = arith.constant 0 : i32
    %c0_i32_0 = arith.constant 0 : i32
    return %arg0, %c0_i32 : i32, i32
  }
  func.func @transform_1(%arg0: i32) -> (i32, i32) {
    %c0_i32 = arith.constant 0 : i32
    %c0_i32_0 = arith.constant 0 : i32
    return %arg0, %c0_i32 : i32, i32
  }
  func.func @transform_2(%arg0: i32) -> (i32, i32) {
    %c0_i32 = arith.constant 0 : i32
    %c0_i32_0 = arith.constant 0 : i32
    %c0_i32_1 = arith.constant 0 : i32
    return %c0_i32, %c0_i32_0 : i32, i32
  }
}

</mosaic_0001>

<bundles_post_ra>
// kernel: cross_entropy_pallas.1
= control target key start
LH: loop header
LB: loop body
LE: loop exit
PB: predicated region body
PF: predicated region fallthrough
CT: control target
= control target key end

     0   :  { %vm29_vm0 = vcmask 39936   ;;  %vm16_vm1 = vcmask 7168   ;;  %v133_v2 = vmov 0   ;;  %v134_v3 = vmov 0.0   ;;  %s171_s0 = inlined_call_operand.vmem [shape: f32[8,5], index: 0, kind: input, shape index: {}]   ;;  %s172_s1 = inlined_call_operand.vmem [shape: s32[8,1], index: 1, kind: input, shape index: {}]   ;;  %s173_s2 = inlined_call_operand.hbm [shape: f32[1,1], index: 2, kind: output, shape index: {}]  }
   0x1   :  { %v19_v0 = vld [vmem:[%s171_s0] sm:$0xff]  ;;  %116 = vset.pattern.permute.xlu0 %v133_v2  ;;  %17 = vst.msk [vmem:[#allocation2] sm:$0xff] %vm16_vm1, %v134_v3  ;;  %18 = vst.msk [vmem:[#allocation3] sm:$0xff] %vm16_vm1, %v134_v3 }
   0x2   :  { %v30_v1 = vsel %vm29_vm0, %v19_v0, -inf }
   0x3   :  { %7 = vsyncpa [#allocation5], 0  ;;  %31 = vmax.xlane.f32.xlu0 %v30_v1  ;;  %v20_v4 = vld [vmem:[%s172_s1] sm:$0xff]  ;;  %v39_v11 = vlaneseq  ;;  %s135_s15 = smov [#allocation4]  }
   0x4   :  { %vm27_vm2 = vcmp.ne.s32.totalorder %v20_v4, 4294967196 }
   0x5   :  { %v106_v5 = vsel %vm27_vm2, 1.0, %v134_v3  ;;  %v40_v12 = vand.u32 127, %v39_v11 }
   0x8   :  { %v57_v6 = vld [vmem:[#allocation3] sm:$0xff]  ;;  %v53_v23 = vld [vmem:[#allocation2] sm:$0xff] }
   0x9   :  { %v60_v7 = vadd.f32 %v106_v5, %v57_v6 }
   0xb   :  { %61 = vst.msk [vmem:[#allocation3] sm:$0xff] %vm16_vm1, %v60_v7 }
  0x12   :  { %v76_v27 = vld [vmem:[#allocation3] sm:$0xff] }
  0x13   :  { %v77_v29 = vsel %vm16_vm1, %v76_v27, 0.0 }
  0x19   :  { %42 = vperm.xlu0 %116, %v20_v4  }
  0x8c   :  { %v32_v8 = vpop.xlane.xlu0 %31 }
  0x8d   :  { %v33_v9 = vsub.f32 %v19_v0, %v32_v8 }
  0x8f   :  { %v34_v10 = vmul.f32 1.442695, %v33_v9 }
  0x91   :  { %117 = vpow2.f32 %v34_v10 }
  0x94   :  { %v43_v13 = vpop.permute.xlu0 %42 }
  0x95   :  { %vm44_vm3 = vcmp.eq.s32.totalorder %v40_v12, %v43_v13 }
  0x96   :  { %v45_v16 = vsel %vm44_vm3, %v33_v9, 0.0 }
  0x97   :  { %v46_v17 = vsel %vm29_vm0, %v45_v16, 0.0 }
  0x9e   :  { %v118_v14 = vpop.eup %117 }
  0x9f   :  { %v36_v15 = vsel %vm29_vm0, %v118_v14, 0.0 }
  0xa0   :  { %37 = vadd.xlane.f32.xlu1 %v36_v15 }
  0xa4   :  { %47 = vadd.xlane.f32.xlu1 %v46_v17 }
 0x129   :  { %v38_v18 = vpop.xlane.xlu1 %37 }
 0x12a   :  { %119 = vlog2.f32 %v38_v18 }
 0x12d   :  { %v48_v21 = vpop.xlane.xlu1 %47 }
 0x137   :  { %v120_v19 = vpop.eup %119 }
 0x138   :  { %v50_v20 = vmul.f32 0.6931472, %v120_v19 }
 0x13a   :  { %v51_v22 = vsub.f32 %v50_v20, %v48_v21 }
 0x13c   :  { %v52_v24 = vsel %vm27_vm2, %v51_v22, 0.0 }
 0x13d   :  { %v54_v25 = vadd.f32 %v53_v23, %v52_v24 }
 0x13f   :  { %56 = vst.msk [vmem:[#allocation2] sm:$0xff] %vm16_vm1, %v54_v25 }
 0x146   :  { %v65_v26 = vld [vmem:[#allocation2] sm:$0xff] }
 0x147   :  { %v66_v28 = vsel %vm16_vm1, %v65_v26, 0.0 }
 0x148   :  { %67 = vadd.xlane.f32.xlu1 %v66_v28 }
 0x14c   :  { %78 = vadd.xlane.f32.xlu1 %v77_v29 }
 0x1d1   :  { %v68_v30 = vpop.xlane.xlu1 %67 }
 0x1d2   :  { %v69_v31 = vrot.slane %v68_v30, 4 }
 0x1d4   :  { %v70_v32 = vadd.f32 %v69_v31, %v68_v30 }
 0x1d5   :  { %v79_v33 = vpop.xlane.xlu1 %78 }
 0x1d6   :  { %v71_v34 = vrot.slane %v70_v32, 2  ;;  %v80_v35 = vrot.slane %v79_v33, 4 }
 0x1d8   :  { %v81_v36 = vadd.f32 %v80_v35, %v79_v33  ;;  %v72_v37 = vadd.f32 %v71_v34, %v70_v32 }
 0x1da   :  { %v82_v38 = vrot.slane %v81_v36, 2  ;;  %v73_v39 = vrot.slane %v72_v37, 1 }
 0x1dc   :  { %v83_v40 = vadd.f32 %v82_v38, %v81_v36  ;;  %v74_v41 = vadd.f32 %v73_v39, %v72_v37 }
 0x1de   :  { %107 = vpush %v74_v41  ;;  %v84_v42 = vrot.slane %v83_v40, 1 }
 0x1e0   :  { %v85_v43 = vadd.f32 %v84_v42, %v83_v40 }
 0x1e2   :  { %109 = vpush %v85_v43 }
 0x20f   :  { %s108_s0 = spop %107 }
 0x213   :  { %s110_s1 = spop %109 }
 0x214   :  { %v87_v44 = vstv %s110_s1 }
 0x215   :  { %121 = vrcp.f32 %v87_v44 }
 0x222   :  { %v122_v45 = vpop.eup %121 }
 0x223   :  { %111 = vpush %v122_v45 }
 0x254   :  { %s112_s13 = spop %111 }
 0x255   :  { %s90_s14 = smul.f32 %s112_s13, %s108_s0 }
 0x257   :  { %92 = sst [smem:[#allocation4]] %s90_s14 }
 0x258   :  { %100 = dma.smem_to_hbm %s135_s15, 16, %s173_s2, [#allocation5]  }
 0x259   :  { %131 = dma.done.wait [#allocation5], 16  }
 0x25a   :  { %132 = vsyncadd [#allocation5], 4294967280 }
 0x25b   :  { %104 = sfence }
 0x25c   :  { %105 = vsyncpa [#allocation5], 1 }

</bundles_post_ra>
